<compile_context>
chip_gen: v5e
topology: v5e:2x2
jax: 0.10.0
libtpu: 0.0.40
codegen_flags: <defaults>
</compile_context>

<pallas_src>
import functools

import jax
import jax.numpy as jnp
from jax.experimental import pallas as pl
from jax.experimental.pallas import tpu as pltpu


def _round_up(x, m):
    return ((x + m - 1) // m) * m


def _physical_vmem_bytes():
    """Per-core VMEM capacity; conservative fallback = v7x (64 MiB)."""
    try:
        return int(pltpu.get_tpu_info().vmem_capacity_bytes)
    except Exception:
        return 64 * 1024 * 1024


def _bql_tile_kernel(q_hat_ref, y_ref, logits_ref, out_ref, *,
                     n_valid, n_quantiles, q_low_val, q_high_val):
    """Per-batch-tile partial sum of the BinarizedQuantileLoss numerator."""
    tile = pl.program_id(0)

    q_hat = q_hat_ref[...].astype(jnp.float32)             # [TB, Q]
    y = y_ref[...].astype(jnp.float32)                      # [TB, 1]
    logits = logits_ref[...].astype(jnp.float32)            # [TB, N] (cast on the tile)
    TB, N = logits.shape

    q_low = q_hat[:, 0:1]                                   # [TB, 1]
    q_high = q_hat[:, n_quantiles - 1:n_quantiles]          # [TB, 1]

    # Valid-row mask: the last tile may contain padded rows when B % TB != 0.
    row = tile * TB + jax.lax.broadcasted_iota(jnp.int32, (TB, 1), 0)
    valid = row < n_valid                                    # [TB, 1] bool

    # ---- find_bin_indices ----
    # Clip in float BEFORE the int cast so extreme outliers cannot overflow /
    # wrap int32 (PyTorch clamps a .long()).  q_high == q_low divides by zero,
    # matching the reference's undefined behavior for degenerate inputs.
    bin_size = (q_high - q_low) / N
    idx = jnp.clip(jnp.floor((y - q_low) / bin_size),
                   0.0, float(N - 1)).astype(jnp.int32)      # [TB, 1]

    # ---- cross-entropy numerator per row, on ONE shifted copy of the tile ----
    m = jnp.max(logits, axis=-1, keepdims=True)              # [TB, 1]
    p = logits - m                                            # [TB, N], reused below
    col = jax.lax.broadcasted_iota(jnp.int32, (TB, N), 1)
    picked = jnp.sum(jnp.where(col == idx, p, 0.0), axis=-1, keepdims=True)
    lse = jnp.log(jnp.sum(jnp.exp(p), axis=-1, keepdims=True))
    ce_rows = lse - picked                                    # [TB, 1]

    # ---- pinball terms per row (sum over the size-1 quantile axis == identity) ----
    def pinball_rows(pred, q):
        err = y - pred
        return jnp.maximum((q - 1.0) * err, q * err)          # [TB, 1]

    rows = ce_rows + pinball_rows(q_low, q_low_val) + pinball_rows(q_high, q_high_val)

    # Select-mask (NOT multiplicative): padded rows may hold NaN/Inf garbage.
    partial = jnp.sum(jnp.where(valid, rows, 0.0))            # scalar partial sum

    # Lane-dense (8,128)-aligned unmasked store; the scalar sits at [0,0] so
    # the host-side finish is a dense jnp.sum over a tiny array (no strided
    # gather, no replication-rounding).
    sub = jax.lax.broadcasted_iota(jnp.int32, (1, 8, 128), 1)
    lane = jax.lax.broadcasted_iota(jnp.int32, (1, 8, 128), 2)
    out_ref[...] = jnp.where((sub == 0) & (lane == 0), partial, 0.0).astype(jnp.float32)


def binarized_quantile_loss(q_hat, y_true, logits, quantiles, *,
                            tb=None, vmem_limit_bytes=None):
    """q_hat: [B, Q], y_true: [B, 1], logits: [B, n_bins] -> scalar loss."""
    B, n_bins = logits.shape
    Q = q_hat.shape[1]
    LANE = 128

    # Per-generation scoped-VMEM limit: ~3/4 of physical, capped at 96 MiB
    # (v5e/v6e physical = 128 MiB, v7x physical = 64 MiB -> 48 MiB).
    if vmem_limit_bytes is None:
        vmem_limit_bytes = min(96 * 1024 * 1024, (3 * _physical_vmem_bytes()) // 4)

    if tb is None:
        # Real per-row VMEM footprint:
        #   * each pipeline buffer (logits, q_hat, y) is padded to 128 lanes in
        #     VMEM and double-buffered by BlockSpec pipelining;
        #   * the kernel body keeps ~6x the padded f32 logits tile live
        #     (upcast, shifted copy, exp, iota, select, slack).
        pipe = 2 * (_round_up(n_bins, LANE) * jnp.dtype(logits.dtype).itemsize
                    + _round_up(Q, LANE) * jnp.dtype(q_hat.dtype).itemsize
                    + LANE * jnp.dtype(y_true.dtype).itemsize)
        tmp = 6 * _round_up(n_bins, LANE) * 4
        per_row = pipe + tmp
        working = (3 * vmem_limit_bytes) // 4       # headroom for compiler scratch
        tb = max(256, min(16384, working // per_row))
    tb = min(_round_up(tb, 8), _round_up(B, 8))
    num_tiles = pl.cdiv(B, tb)

    kernel = functools.partial(
        _bql_tile_kernel,
        n_valid=B,
        n_quantiles=Q,
        q_low_val=float(quantiles[0]),
        q_high_val=float(quantiles[-1]),
    )

    cost = pl.CostEstimate(
        flops=int(8 * B * n_bins),
        transcendentals=int(B * (n_bins + 2)),
        bytes_accessed=int(B * (n_bins * jnp.dtype(logits.dtype).itemsize
                                + Q * jnp.dtype(q_hat.dtype).itemsize
                                + jnp.dtype(y_true.dtype).itemsize)
                           + num_tiles * 8 * 128 * 4),
    )

    partials = pl.pallas_call(
        kernel,
        out_shape=jax.ShapeDtypeStruct((num_tiles, 8, 128), jnp.float32),
        grid=(num_tiles,),
        in_specs=[
            pl.BlockSpec((tb, Q), lambda i: (i, 0)),        # q_hat (sliced in-kernel)
            pl.BlockSpec((tb, 1), lambda i: (i, 0)),        # y_true
            pl.BlockSpec((tb, n_bins), lambda i: (i, 0)),   # logits, original dtype
        ],
        out_specs=pl.BlockSpec((1, 8, 128), lambda i: (i, 0, 0)),
        compiler_params=pltpu.CompilerParams(
            dimension_semantics=("parallel",),
            vmem_limit_bytes=int(vmem_limit_bytes),
        ),
        cost_estimate=cost,
    )(q_hat, y_true, logits)

    # Dense reduce over a tiny array (each tile's partial sits at [t, 0, 0],
    # the rest of the block is zero), divided by the true batch size.
    return jnp.sum(partials) / B


def _reference(q_hat, y_true, logits, quantiles):
    """Pure-JAX reference mirroring the PyTorch module."""
    q_low = q_hat[:, 0:1]
    q_high = q_hat[:, -1:]
    n_bins = logits.shape[1]
    bin_size = (q_high - q_low) / n_bins
    idx = jnp.clip(jnp.floor((y_true - q_low) / bin_size).astype(jnp.int32),
                   0, n_bins - 1).squeeze()
    log_p = jax.nn.log_softmax(logits, axis=-1)
    ce = -jnp.mean(jnp.take_along_axis(log_p, idx[:, None], axis=1))

    def pinball(pred, q):
        err = y_true - pred
        return jnp.mean(jnp.sum(jnp.maximum((q - 1.0) * err, q * err), axis=1))

    return ce + pinball(q_low, quantiles[0]) + pinball(q_high, quantiles[-1])


if __name__ == "__main__":
    # deterministic "module parameters": the registered quantiles buffer
    quantiles = [0.1, 0.5, 0.9]

    # --- Test 1: single small tile, f32 inputs, auto tb ---
    B, n_bins = 8, 32
    k1, k2, k3 = jax.random.split(jax.random.PRNGKey(0), 3)
    q_hat = jnp.sort(jax.random.normal(k1, (B, len(quantiles)), jnp.float32), axis=1)
    y_true = jax.random.normal(k2, (B, 1), jnp.float32)
    logits = jax.random.normal(k3, (B, n_bins), jnp.float32)

    loss = jax.block_until_ready(
        binarized_quantile_loss(q_hat, y_true, logits, quantiles))
    ref = _reference(q_hat, y_true, logits, jnp.asarray(quantiles, jnp.float32))
    assert jnp.allclose(loss, ref, rtol=1e-5, atol=1e-5), (loss, ref)

    # --- Test 2: multi-tile grid with a padded last tile + bf16 logits over the wire ---
    B2 = 13
    k4, k5, k6 = jax.random.split(jax.random.PRNGKey(1), 3)
    q_hat2 = jnp.sort(jax.random.normal(k4, (B2, len(quantiles)), jnp.float32), axis=1)
    y2 = jax.random.normal(k5, (B2, 1), jnp.float32)
    logits2 = jax.random.normal(k6, (B2, n_bins), jnp.float32).astype(jnp.bfloat16)

    loss2 = jax.block_until_ready(
        binarized_quantile_loss(q_hat2, y2, logits2, quantiles, tb=8))
    ref2 = _reference(q_hat2, y2, logits2.astype(jnp.float32),
                      jnp.asarray(quantiles, jnp.float32))
    assert jnp.allclose(loss2, ref2, rtol=1e-5, atol=1e-5), (loss2, ref2)

    # --- Test 3: larger batch exercising the enlarged auto-tb path ---
    B3 = 4096
    k7, k8, k9 = jax.random.split(jax.random.PRNGKey(2), 3)
    q_hat3 = jnp.sort(jax.random.normal(k7, (B3, len(quantiles)), jnp.float32), axis=1)
    y3 = jax.random.normal(k8, (B3, 1), jnp.float32)
    logits3 = jax.random.normal(k9, (B3, n_bins), jnp.float32)

    loss3 = jax.block_until_ready(
        binarized_quantile_loss(q_hat3, y3, logits3, quantiles))
    ref3 = _reference(q_hat3, y3, logits3, jnp.asarray(quantiles, jnp.float32))
    assert jnp.allclose(loss3, ref3, rtol=1e-4, atol=1e-4), (loss3, ref3)

    print("KERNEL_OK")
</pallas_src>

<mosaic_0001>
module attributes {stable_mosaic.version = 11 : i64} {
  func.func @_bql_tile_kernel(%arg0: i32, %arg1: memref<8x3xf32, #tpu.memory_space<vmem>>, %arg2: memref<8x1xf32, #tpu.memory_space<vmem>>, %arg3: memref<8x32xf32, #tpu.memory_space<vmem>>, %arg4: memref<1x8x128xf32, #tpu.memory_space<vmem>>) attributes {dimension_semantics = [#tpu.dimension_semantics<parallel>], iteration_bounds = array<i64: 1>, scalar_prefetch = 0 : i64, scratch_operands = 0 : i64, tpu.core_type = #tpu.core_type<tc>, window_params = [{transform_indices = @transform_0, window_bounds = array<i64: 8, 3>}, {transform_indices = @transform_1, window_bounds = array<i64: 8, 1>}, {transform_indices = @transform_2, window_bounds = array<i64: 8, 32>}, {transform_indices = @transform_3, window_bounds = array<i64: 1, 8, 128>}]} {
    %c0 = arith.constant 0 : index
    %c0_0 = arith.constant 0 : index
    %0 = vector.load %arg1[%c0, %c0_0] : memref<8x3xf32, #tpu.memory_space<vmem>>, vector<8x3xf32>
    %c0_1 = arith.constant 0 : index
    %c0_2 = arith.constant 0 : index
    %1 = vector.load %arg2[%c0_1, %c0_2] : memref<8x1xf32, #tpu.memory_space<vmem>>, vector<8x1xf32>
    %c0_3 = arith.constant 0 : index
    %c0_4 = arith.constant 0 : index
    %2 = vector.load %arg3[%c0_3, %c0_4] : memref<8x32xf32, #tpu.memory_space<vmem>>, vector<8x32xf32>
    %3 = vector.extract_strided_slice %0 {offsets = [0, 0], sizes = [8, 1], strides = [1, 1]} : vector<8x3xf32> to vector<8x1xf32>
    %4 = vector.extract_strided_slice %0 {offsets = [0, 2], sizes = [8, 1], strides = [1, 1]} : vector<8x3xf32> to vector<8x1xf32>
    %c8_i32 = arith.constant 8 : i32
    %5 = arith.muli %arg0, %c8_i32 : i32
    %6 = tpu.iota {dimensions = array<i32: 0>} : vector<8x1xi32>
    %7 = vector.broadcast %5 : i32 to vector<8x1xi32>
    %8 = arith.addi %7, %6 : vector<8x1xi32>
    %c8_i32_5 = arith.constant 8 : i32
    %9 = vector.broadcast %c8_i32_5 : i32 to vector<8x1xi32>
    %10 = arith.cmpi slt, %8, %9 : vector<8x1xi32>
    %11 = arith.subf %4, %3 : vector<8x1xf32>
    %cst = arith.constant 3.200000e+01 : f32
    %12 = vector.broadcast %cst : f32 to vector<8x1xf32>
    %13 = arith.divf %11, %12 : vector<8x1xf32>
    %14 = arith.subf %1, %3 : vector<8x1xf32>
    %15 = arith.divf %14, %13 : vector<8x1xf32>
    %16 = math.floor %15 : vector<8x1xf32>
    %cst_6 = arith.constant 0.000000e+00 : f32
    %cst_7 = arith.constant 3.100000e+01 : f32
    %17 = vector.broadcast %cst_6 : f32 to vector<8x1xf32>
    %18 = arith.maximumf %17, %16 : vector<8x1xf32>
    %19 = vector.broadcast %cst_7 : f32 to vector<8x1xf32>
    %20 = arith.minimumf %19, %18 : vector<8x1xf32>
    %21 = arith.fptosi %20 : vector<8x1xf32> to vector<8x1xi32>
    %cst_8 = arith.constant dense<0xFF800000> : vector<8xf32>
    %22 = vector.multi_reduction <maximumf>, %2, %cst_8 [1] : vector<8x32xf32> to vector<8xf32>
    %23 = vector.shape_cast %22 : vector<8xf32> to vector<8x1xf32>
    %24 = vector.broadcast %23 : vector<8x1xf32> to vector<8x32xf32>
    %25 = arith.subf %2, %24 : vector<8x32xf32>
    %26 = tpu.iota {dimensions = array<i32: 1>} : vector<8x32xi32>
    %27 = vector.broadcast %21 : vector<8x1xi32> to vector<8x32xi32>
    %28 = arith.cmpi eq, %26, %27 : vector<8x32xi32>
    %cst_9 = arith.constant 0.000000e+00 : f32
    %29 = vector.broadcast %cst_9 : f32 to vector<8x32xf32>
    %30 = arith.select %28, %25, %29 : vector<8x32xi1>, vector<8x32xf32>
    %cst_10 = arith.constant dense<0.000000e+00> : vector<8xf32>
    %31 = vector.multi_reduction <add>, %30, %cst_10 [1] : vector<8x32xf32> to vector<8xf32>
    %32 = vector.shape_cast %31 : vector<8xf32> to vector<8x1xf32>
    %33 = math.exp %25 : vector<8x32xf32>
    %cst_11 = arith.constant dense<0.000000e+00> : vector<8xf32>
    %34 = vector.multi_reduction <add>, %33, %cst_11 [1] : vector<8x32xf32> to vector<8xf32>
    %35 = vector.shape_cast %34 : vector<8xf32> to vector<8x1xf32>
    %36 = math.log %35 : vector<8x1xf32>
    %37 = arith.subf %36, %32 : vector<8x1xf32>
    %38 = arith.subf %1, %3 : vector<8x1xf32>
    %cst_12 = arith.constant -0.899999976 : f32
    %39 = vector.broadcast %cst_12 : f32 to vector<8x1xf32>
    %40 = arith.mulf %39, %38 : vector<8x1xf32>
    %cst_13 = arith.constant 1.000000e-01 : f32
    %41 = vector.broadcast %cst_13 : f32 to vector<8x1xf32>
    %42 = arith.mulf %41, %38 : vector<8x1xf32>
    %43 = arith.maximumf %40, %42 : vector<8x1xf32>
    %44 = arith.addf %37, %43 : vector<8x1xf32>
    %45 = arith.subf %1, %4 : vector<8x1xf32>
    %cst_14 = arith.constant -1.000000e-01 : f32
    %46 = vector.broadcast %cst_14 : f32 to vector<8x1xf32>
    %47 = arith.mulf %46, %45 : vector<8x1xf32>
    %cst_15 = arith.constant 0.899999976 : f32
    %48 = vector.broadcast %cst_15 : f32 to vector<8x1xf32>
    %49 = arith.mulf %48, %45 : vector<8x1xf32>
    %50 = arith.maximumf %47, %49 : vector<8x1xf32>
    %51 = arith.addf %44, %50 : vector<8x1xf32>
    %cst_16 = arith.constant 0.000000e+00 : f32
    %52 = vector.broadcast %cst_16 : f32 to vector<8x1xf32>
    %53 = arith.select %10, %51, %52 : vector<8x1xi1>, vector<8x1xf32>
    %54 = vector.shape_cast %53 : vector<8x1xf32> to vector<1x8x1xf32>
    %cst_17 = arith.constant dense<0.000000e+00> : vector<1xf32>
    %55 = vector.multi_reduction <add>, %54, %cst_17 [1, 2] : vector<1x8x1xf32> to vector<1xf32>
    %56 = vector.shape_cast %55 : vector<1xf32> to vector<1x1x1xf32>
    %57 = vector.extract %56[0, 0, 0] : f32 from vector<1x1x1xf32>
    %58 = tpu.iota {dimensions = array<i32: 1>} : vector<1x8x128xi32>
    %59 = tpu.iota {dimensions = array<i32: 2>} : vector<1x8x128xi32>
    %c0_i32 = arith.constant 0 : i32
    %60 = vector.broadcast %c0_i32 : i32 to vector<1x8x128xi32>
    %61 = arith.cmpi eq, %58, %60 : vector<1x8x128xi32>
    %c0_i32_18 = arith.constant 0 : i32
    %62 = vector.broadcast %c0_i32_18 : i32 to vector<1x8x128xi32>
    %63 = arith.cmpi eq, %59, %62 : vector<1x8x128xi32>
    %64 = arith.andi %61, %63 : vector<1x8x128xi1>
    %cst_19 = arith.constant 0.000000e+00 : f32
    %65 = vector.broadcast %57 : f32 to vector<1x8x128xf32>
    %66 = vector.broadcast %cst_19 : f32 to vector<1x8x128xf32>
    %67 = arith.select %64, %65, %66 : vector<1x8x128xi1>, vector<1x8x128xf32>
    %c0_20 = arith.constant 0 : index
    %c0_21 = arith.constant 0 : index
    %c0_22 = arith.constant 0 : index
    %68 = vector.load %arg4[%c0_20, %c0_21, %c0_22] : memref<1x8x128xf32, #tpu.memory_space<vmem>>, vector<1x8x128xf32>
    tpu.vector_store %arg4[%c0_20, %c0_21, %c0_22], %67 {strides = array<i32>} : memref<1x8x128xf32, #tpu.memory_space<vmem>>, vector<1x8x128xf32>,
    return
  }
  func.func @transform_0(%arg0: i32) -> (i32, i32) {
    %c0_i32 = arith.constant 0 : i32
    %c0_i32_0 = arith.constant 0 : i32
    return %arg0, %c0_i32 : i32, i32
  }
  func.func @transform_1(%arg0: i32) -> (i32, i32) {
    %c0_i32 = arith.constant 0 : i32
    %c0_i32_0 = arith.constant 0 : i32
    return %arg0, %c0_i32 : i32, i32
  }
  func.func @transform_2(%arg0: i32) -> (i32, i32) {
    %c0_i32 = arith.constant 0 : i32
    %c0_i32_0 = arith.constant 0 : i32
    return %arg0, %c0_i32 : i32, i32
  }
  func.func @transform_3(%arg0: i32) -> (i32, i32, i32) {
    %c0_i32 = arith.constant 0 : i32
    %c0_i32_0 = arith.constant 0 : i32
    %c0_i32_1 = arith.constant 0 : i32
    return %arg0, %c0_i32, %c0_i32_0 : i32, i32, i32
  }
}

</mosaic_0001>

<bundles_post_ra>
// kernel: tpu_custom_call.1
= control target key start
LH: loop header
LB: loop body
LE: loop exit
PB: predicated region body
PF: predicated region fallthrough
CT: control target
= control target key end

     0   :  { %s175_s14 = smov 2   ;;  %s217_s0 = inlined_call_operand.vmem [shape: f32[8,3], index: 0, kind: input, shape index: {}]   ;;  %s218_s1 = inlined_call_operand.vmem [shape: f32[8,1], index: 1, kind: input, shape index: {}]   ;;  %s219_s2 = inlined_call_operand.vmem [shape: f32[8,32], index: 2, kind: input, shape index: {}]   ;;  %s220_s3 = inlined_call_operand.hbm [shape: f32[1,8,128], index: 3, kind: output, shape index: {}]  }
   0x1   :  { %v15_v0 = vld [vmem:[%s217_s0] sm:$0xff] }
   0x2   :  { %25 = vrot.lane.b32.xlu0 %v15_v0, %s175_s14 }
   0x3   :  { %8 = vsyncpa [#allocation3], 0  ;;  %v176_v1 = vmov 32.0   ;;  %s177_s15 = smov 126   ;;  %v17_v11 = vld [vmem:[%s219_s2] sm:$0xff]  ;;  %vm61_vm1 = vcmask 261120   ;;  %v19_v37 = vlaneseq }
   0x4   :  { %141 = vrcp.f32 %v176_v1  ;;  %v62_v12 = vsel %vm61_vm1, %v17_v11, -inf  ;;  %v178_v13 = vmov 0   ;;  %v16_v18 = vld [vmem:[%s218_s1] sm:$0xff]  ;;  %vm97_vm7 = vcmask 7168   ;;  %s179_s1 = smov [#allocation2]   ;;  %s121_s21 = sshll.u32 %s220_s3, 4  ;;  %s122_s21 = int_to_ptr.hbm [resolvable:$true] %s121_s21 }
   0x5   :  { %63 = vmax.xlane.f32.xlu1 %v62_v12  ;;  %140 = vset.pattern.permute.xlu0 %v178_v13  ;;  %v37_v22 = vsub.f32 %v16_v18, %v15_v0  ;;  %v67_v38 = vand.u32 127, %v19_v37  ;;  %v20_v1 = vshrl.u32 %v19_v37, 7  ;;  %s119_s2 = sshll.u32 %s179_s1, 4  ;;  %s120_s2 = int_to_ptr.vmem [resolvable:$true] %s119_s2 }
   0x6   :  { %139 = vset.pattern.permute.xlu1 %v178_v13 }
   0x7   :  { %v84_v45 = vmul.f32 -0.9, %v37_v22  ;;  %v85_v46 = vmul.f32 0.1, %v37_v22  ;;  %vm108_vm8 = vcmp.eq.s32.totalorder %v20_v1, 0  ;;  %vm109_vm9 = vcmp.eq.s32.totalorder %v67_v38, 0 }
   0x8   :  { %vm110_vm10 = vmand %vm108_vm8, %vm109_vm9 }
   0x9   :  { %v86_v51 = vmax.f32 %v84_v45, %v85_v46 }
   0xa   :  { %v142_v2 = vpop.eup %141 }
   0xb   :  { %v30_v3 = vmul.f32 32.0, %v142_v2  ;;  %vm34_vm0 = vweird.f32 %v142_v2 }
   0xd   :  { %v31_v4 = vsub.f32 1.0, %v30_v3 }
   0xf   :  { %v32_v5 = vmul.f32 %v142_v2, %v31_v4 }
  0x11   :  { %v33_v6 = vadd.f32 %v142_v2, %v32_v5 }
  0x13   :  { %v35_v7 = vsel %vm34_vm0, %v142_v2, %v33_v6 }
  0x74   :  { %v26_v8 = vpop.permute.xlu0 %25 }
  0x75   :  { %v28_v9 = vsub.f32 %v15_v0, %v26_v8 }
  0x77   :  { %v36_v10 = vmul.f32 %v35_v7, %v28_v9 }
  0x78   :  { %v64_v32 = vpop.xlane.xlu1 %63 }
  0x79   :  { %39 = vrot.lane.b32.xlu0 %v36_v10, %s177_s15  ;;  %v65_v33 = vsub.f32 %v17_v11, %v64_v32 }
  0x7b   :  { %v76_v34 = vmul.f32 1.442695, %v65_v33 }
  0xeb   :  { %v40_v14 = vpop.permute.xlu0 %39 }
  0xec   :  { %143 = vrcp.f32 %v40_v14  ;;  %v53_v19 = vand.u32 2147483648, %v40_v14  ;;  %v51_v21 = vand.u32 2147483647, %v40_v14  ;;  %vm47_vm3 = vweird.f32 %v40_v14 }
  0xed   :  { %145 = vpow2.f32 %v76_v34 }
  0xee   :  { %v54_v24 = vor.u32 1.1754944e-38, %v53_v19  ;;  %vm52_vm5 = vcmp.eq.f32.partialorder %v51_v21, 8.507059e+37 }
  0xf2   :  { %v144_v15 = vpop.eup %143 }
  0xf3   :  { %v43_v16 = vmul.f32 %v144_v15, %v40_v14  ;;  %vm48_vm2 = vweird.f32 %v144_v15  ;;  %v146_v35 = vpop.eup %145 }
  0xf4   :  { %vm49_vm4 = vmor %vm47_vm3, %vm48_vm2  ;;  %v78_v36 = vsel %vm61_vm1, %v146_v35, 0.0 }
  0xf5   :  { %v44_v17 = vsub.f32 1.0, %v43_v16  ;;  %79 = vadd.xlane.f32.xlu2 %v78_v36 }
  0xf7   :  { %v45_v20 = vmul.f32 %v144_v15, %v44_v17 }
  0xf9   :  { %v46_v23 = vadd.f32 %v144_v15, %v45_v20 }
  0xfb   :  { %v50_v25 = vsel %vm49_vm4, %v144_v15, %v46_v23 }
  0xfc   :  { %v55_v26 = vsel %vm52_vm5, %v54_v24, %v50_v25 }
  0xfd   :  { %v56_v27 = vmul.f32 %v55_v26, %v37_v22 }
  0xff   :  { %v57_v28 = vfloor.f32 %v56_v27 }
 0x101   :  { %v58_v29 = vmax.f32 %v57_v28, 0.0 }
 0x103   :  { %v59_v30 = vmin.f32 %v58_v29, 31.0 }
 0x105   :  { %v131_v31 = vcvt.f32.s32 %v59_v30 }
 0x107   :  { %69 = vperm.xlu1 %139, %v131_v31  }
 0x10d   :  { %88 = vrot.lane.b32.xlu2 %v15_v0, %s177_s15 }
 0x168   :  { %v80_v42 = vpop.xlane.xlu2 %79 }
 0x169   :  { %147 = vlog2.f32 %v80_v42 }
 0x16f   :  { %v148_v47 = vpop.eup %147 }
 0x170   :  { %v89_v43 = vpop.permute.xlu2 %88  ;;  %v82_v50 = vmul.f32 0.6931472, %v148_v47 }
 0x171   :  { %v91_v44 = vsub.f32 %v16_v18, %v89_v43 }
 0x173   :  { %v92_v48 = vmul.f32 -0.1, %v91_v44  ;;  %v93_v49 = vmul.f32 0.9, %v91_v44 }
 0x175   :  { %v94_v54 = vmax.f32 %v92_v48, %v93_v49 }
 0x179   :  { %v70_v39 = vpop.permute.xlu1 %69 }
 0x17a   :  { %vm71_vm6 = vcmp.eq.s32.totalorder %v67_v38, %v70_v39 }
 0x17b   :  { %v72_v40 = vsel %vm71_vm6, %v65_v33, 0.0 }
 0x17c   :  { %v73_v41 = vsel %vm61_vm1, %v72_v40, 0.0 }
 0x17d   :  { %74 = vadd.xlane.f32.xlu0 %v73_v41 }
 0x1f0   :  { %v75_v52 = vpop.xlane.xlu0 %74 }
 0x1f1   :  { %v83_v53 = vsub.f32 %v82_v50, %v75_v52 }
 0x1f3   :  { %v87_v55 = vadd.f32 %v86_v51, %v83_v53 }
 0x1f5   :  { %v95_v56 = vadd.f32 %v94_v54, %v87_v55 }
 0x1f7   :  { %v98_v57 = vsel %vm97_vm7, %v95_v56, 0.0 }
 0x1f8   :  { %99 = vadd.xlane.f32.xlu2 %v98_v57 }
 0x26b   :  { %v100_v58 = vpop.xlane.xlu2 %99 }
 0x26c   :  { %v101_v59 = vrot.slane %v100_v58, 4 }
 0x26e   :  { %v102_v60 = vadd.f32 %v101_v59, %v100_v58 }
 0x270   :  { %v103_v61 = vrot.slane %v102_v60, 2 }
 0x272   :  { %v104_v62 = vadd.f32 %v103_v61, %v102_v60 }
 0x274   :  { %v105_v63 = vrot.slane %v104_v62, 1 }
 0x276   :  { %v106_v0 = vadd.f32 %v105_v63, %v104_v62 }
 0x278   :  { %132 = vpush %v106_v0 }
 0x2a9   :  { %s133_s22 = spop %132 }
 0x2aa   :  { %v111_v2 = vstv %s133_s22 }
 0x2ab   :  { %v112_v3 = vsel %vm110_vm10, %v111_v2, 0.0 }
 0x2ac   :  { %113 = vst [vmem:[#allocation2] sm:$0xff] %v112_v3 }
 0x2ad   :  { %124 = dma.vmem_to_hbm [thread:$0]  %s120_s2, 128, %s122_s21, [#allocation3]  }
 0x2ae   :  { %173 = dma.done.wait [#allocation3], 128  }
 0x2af   :  { %174 = vsyncadd [#allocation3], 4294967168 }
 0x2b0   :  { %129 = vsyncpa [#allocation3], 1 }

</bundles_post_ra>
